<compile_context>
chip_gen: v7x
topology: tpu7x:2x2x1
jax: 0.10.0
libtpu: 0.0.40
codegen_flags: <defaults>
</compile_context>

<pallas_src>
import functools

import jax
import jax.numpy as jnp
from jax.experimental import pallas as pl
from jax.experimental.pallas import tpu as pltpu

SEQ = 28        # sequence length (image rows)
INP = 28        # input size per step
HID = 64        # hidden size
OUT = 10        # linear output size
OUT_PAD = 128   # linear output padded to a full lane group (unmasked stores)


# ---------------------------------------------------------------------------
# Generation-aware tiling.
# A (28, 28) f32 image slab occupies a padded (32, 128) tile = 16 KiB in VMEM,
# so a (tb, 28, 28) block costs tb*16 KiB; input+output double-buffered is
# roughly tb*64 KiB.
# ---------------------------------------------------------------------------
def _vmem_capacity_bytes():
    try:
        info = pltpu.get_tpu_info()
        cap = getattr(info, "vmem_capacity_bytes", None)
        if cap:
            return int(cap)
    except Exception:
        pass
    return 64 * 1024 * 1024          # conservative (v7x-sized) fallback


_VMEM_CAP = _vmem_capacity_bytes()
_BIG_VMEM = _VMEM_CAP >= 100 * 1024 * 1024         # v5e / v6e: 128 MiB
TB_MAX = 1024 if _BIG_VMEM else 256                # rows (images) per block
VMEM_LIMIT = (96 if _BIG_VMEM else 32) * 1024 * 1024
_SPLIT_FOR_MEGACORE = not _BIG_VMEM                # v7x has 2 TensorCores


def _round_up(n, m):
    return ((n + m - 1) // m) * m


def _pick_tb(b):
    """Images per grid block."""
    if b > TB_MAX:
        return TB_MAX
    if _SPLIT_FOR_MEGACORE and b >= 128:
        half = _round_up((b + 1) // 2, 8)          # keep blocks 8-row aligned
        if half < b:
            return half                            # >=2 blocks -> both v7x TCs
    return b


# ---------------------------------------------------------------------------
# Kernels
# ---------------------------------------------------------------------------
def softmax_dim1_kernel(x_ref, probs_ref):
    """softmax over axis=1 of a (tb, SEQ, INP) block, kept in input layout."""
    x = x_ref[...]                                   # (tb, SEQ, INP) f32
    m = jnp.max(x, axis=1, keepdims=True)            # (tb, 1, INP)
    e = jnp.exp(x - m)
    s = jnp.sum(e, axis=1, keepdims=True)
    probs_ref[...] = e * (1.0 / s)


def fused_rnn_softmax_kernel(x_ref,      # (tb, SEQ, INP) f32
                             wih_ref,    # (INP, HID)  bf16  = W_ih^T
                             whh_ref,    # (HID, HID)  bf16  = W_hh^T
                             b_ref,      # (1, HID)    f32   = b_ih + b_hh
                             wout_ref,   # (HID, OUT_PAD) bf16 (zero padded)
                             bout_ref,   # (1, OUT_PAD)   f32 (zero padded)
                             probs_ref,  # (tb, SEQ, INP) f32
                             logits_ref):  # (tb, OUT_PAD) f32
    # ---- softmax over dim=1 (the only live output of the reference) --------
    x = x_ref[...]
    m = jnp.max(x, axis=1, keepdims=True)
    e = jnp.exp(x - m)
    s = jnp.sum(e, axis=1, keepdims=True)
    probs_ref[...] = e * (1.0 / s)

    # ---- RNN(tanh) + Linear on the last step (dead in the reference) -------
    # bf16 MXU operands / f32 accumulation & tanh; bf16 rounding drifts a
    # little from an f32 PyTorch reference over 28 steps (output is discarded).
    wih = wih_ref[...]
    whh = whh_ref[...]
    bias = b_ref[...]
    tb = x_ref.shape[0]
    h = jnp.zeros((tb, HID), jnp.float32)
    for t in range(SEQ):                             # static full unroll
        xt = x_ref[:, t, :].astype(jnp.bfloat16)     # (tb, INP)
        h = jnp.tanh(
            jnp.dot(xt, wih, preferred_element_type=jnp.float32)
            + jnp.dot(h.astype(jnp.bfloat16), whh,
                      preferred_element_type=jnp.float32)
            + bias)
    logits_ref[...] = (jnp.dot(h.astype(jnp.bfloat16), wout_ref[...],
                               preferred_element_type=jnp.float32)
                       + bout_ref[...])


# ---------------------------------------------------------------------------
# Parameters (PyTorch-style init) and kernel-ready packing.
# ---------------------------------------------------------------------------
def init_params(key):
    k = 1.0 / jnp.sqrt(jnp.float32(HID))
    ks = jax.random.split(key, 6)
    u = lambda kk, shape: jax.random.uniform(kk, shape, jnp.float32, -k, k)
    return dict(
        w_ih=u(ks[0], (HID, INP)),
        w_hh=u(ks[1], (HID, HID)),
        b_ih=u(ks[2], (HID,)),
        b_hh=u(ks[3], (HID,)),
        w_out=u(ks[4], (OUT, HID)),
        b_out=u(ks[5], (OUT,)),
    )


def pack_params(p):
    """Transpose weights for right-multiplication, cast MXU operands to bf16,
    fold the two RNN biases (exact), pad the Linear output to 128 lanes."""
    wout_t = jnp.zeros((HID, OUT_PAD), jnp.float32).at[:, :OUT].set(p["w_out"].T)
    b_out = jnp.zeros((1, OUT_PAD), jnp.float32).at[:, :OUT].set(p["b_out"][None, :])
    return dict(
        wih_t=p["w_ih"].T.astype(jnp.bfloat16),       # (INP, HID)
        whh_t=p["w_hh"].T.astype(jnp.bfloat16),       # (HID, HID)
        b=(p["b_ih"] + p["b_hh"]).reshape(1, HID),    # (1, HID) f32
        wout_t=wout_t.astype(jnp.bfloat16),           # (HID, OUT_PAD)
        b_out=b_out,                                  # (1, OUT_PAD) f32
    )


# ---------------------------------------------------------------------------
# Forward wrapper (mirrors Rnn.forward).  The RNN+Linear result is discarded
# by the reference module, so compute_rnn defaults to False.
# ---------------------------------------------------------------------------
@functools.partial(jax.jit, static_argnames=("compute_rnn",))
def rnn_module_forward(x, params, compute_rnn=False):
    """Returns (softmax(x.reshape(-1,28,28), dim=1), logits-or-None)."""
    xr = jnp.reshape(x, (-1, SEQ, INP)).astype(jnp.float32)   # free reshape
    b = xr.shape[0]
    tb = _pick_tb(b)
    nblk = pl.cdiv(b, tb)

    cparams = pltpu.CompilerParams(
        dimension_semantics=("parallel",),            # batch blocks -> TCs
        vmem_limit_bytes=VMEM_LIMIT)
    x_spec = pl.BlockSpec((tb, SEQ, INP), lambda i: (i, 0, 0))

    if not compute_rnn:
        probs = pl.pallas_call(
            softmax_dim1_kernel,
            out_shape=jax.ShapeDtypeStruct((b, SEQ, INP), jnp.float32),
            grid_spec=pltpu.PrefetchScalarGridSpec(
                num_scalar_prefetch=0,
                grid=(nblk,),
                in_specs=[x_spec],
                out_specs=x_spec),
            compiler_params=cparams,
        )(xr)
        return probs, None

    probs, logits_pad = pl.pallas_call(
        fused_rnn_softmax_kernel,
        out_shape=(jax.ShapeDtypeStruct((b, SEQ, INP), jnp.float32),
                   jax.ShapeDtypeStruct((b, OUT_PAD), jnp.float32)),
        grid_spec=pltpu.PrefetchScalarGridSpec(
            num_scalar_prefetch=0,
            grid=(nblk,),
            in_specs=[
                x_spec,                                        # single x view
                pl.BlockSpec((INP, HID), lambda i: (0, 0)),
                pl.BlockSpec((HID, HID), lambda i: (0, 0)),
                pl.BlockSpec((1, HID), lambda i: (0, 0)),
                pl.BlockSpec((HID, OUT_PAD), lambda i: (0, 0)),
                pl.BlockSpec((1, OUT_PAD), lambda i: (0, 0)),
            ],
            out_specs=(
                x_spec,                                        # probs
                pl.BlockSpec((tb, OUT_PAD), lambda i: (i, 0)),  # logits
            )),
        compiler_params=cparams,
    )(xr, params["wih_t"], params["whh_t"], params["b"],
      params["wout_t"], params["b_out"])
    return probs, logits_pad[:, :OUT]


if __name__ == "__main__":
    key = jax.random.PRNGKey(0)
    k_x, k_p = jax.random.split(key)

    # Small MNIST-like NCHW input (forward reshapes it to (-1, 28, 28)).
    x = jax.random.normal(k_x, (2, 1, 28, 28), jnp.float32)
    params = pack_params(init_params(k_p))

    # Default / hot path: dead RNN branch dropped, pure mem-bound softmax.
    probs, _ = rnn_module_forward(x, params)
    jax.block_until_ready(probs)

    # Full path (RNN + Linear computed too) for API completeness.
    probs_full, logits = rnn_module_forward(x, params, compute_rnn=True)
    jax.block_until_ready((probs_full, logits))

    # Reference: plain-JAX softmax over dim=1 of the reshaped input.
    ref = jax.nn.softmax(x.reshape(-1, SEQ, INP), axis=1)

    assert probs.shape == (2, SEQ, INP)
    assert logits.shape == (2, OUT)
    assert bool(jnp.allclose(jnp.sum(probs, axis=1), 1.0, atol=1e-5))
    assert bool(jnp.allclose(probs, ref, atol=1e-5))
    assert bool(jnp.allclose(probs_full, ref, atol=1e-5))

    print("KERNEL_OK")
</pallas_src>

<mosaic_0001>
module attributes {stable_mosaic.version = 11 : i64} {
  func.func @softmax_dim1_kernel(%arg0: i32, %arg1: memref<2x28x28xf32, #tpu.memory_space<vmem>>, %arg2: memref<2x28x28xf32, #tpu.memory_space<vmem>>) attributes {dimension_semantics = [#tpu.dimension_semantics<parallel>], iteration_bounds = array<i64: 1>, scalar_prefetch = 0 : i64, scratch_operands = 0 : i64, tpu.core_type = #tpu.core_type<tc>, window_params = [{transform_indices = @transform_0, window_bounds = array<i64: 2, 28, 28>}, {transform_indices = @transform_1, window_bounds = array<i64: 2, 28, 28>}]} {
    %c0 = arith.constant 0 : index
    %c0_0 = arith.constant 0 : index
    %c0_1 = arith.constant 0 : index
    %0 = vector.load %arg1[%c0, %c0_0, %c0_1] : memref<2x28x28xf32, #tpu.memory_space<vmem>>, vector<2x28x28xf32>
    %cst = arith.constant dense<0xFF800000> : vector<2x28xf32>
    %1 = vector.multi_reduction <maximumf>, %0, %cst [1] : vector<2x28x28xf32> to vector<2x28xf32>
    %2 = vector.shape_cast %1 : vector<2x28xf32> to vector<2x1x28xf32>
    %3 = vector.broadcast %2 : vector<2x1x28xf32> to vector<2x28x28xf32>
    %4 = arith.subf %0, %3 : vector<2x28x28xf32>
    %5 = math.exp %4 : vector<2x28x28xf32>
    %cst_2 = arith.constant dense<0.000000e+00> : vector<2x28xf32>
    %6 = vector.multi_reduction <add>, %5, %cst_2 [1] : vector<2x28x28xf32> to vector<2x28xf32>
    %7 = vector.shape_cast %6 : vector<2x28xf32> to vector<2x1x28xf32>
    %cst_3 = arith.constant 1.000000e+00 : f32
    %8 = vector.broadcast %cst_3 : f32 to vector<2x1x28xf32>
    %9 = arith.divf %8, %7 : vector<2x1x28xf32>
    %10 = vector.broadcast %9 : vector<2x1x28xf32> to vector<2x28x28xf32>
    %11 = arith.mulf %5, %10 : vector<2x28x28xf32>
    %c0_4 = arith.constant 0 : index
    %c0_5 = arith.constant 0 : index
    %c0_6 = arith.constant 0 : index
    %12 = vector.load %arg2[%c0_4, %c0_5, %c0_6] : memref<2x28x28xf32, #tpu.memory_space<vmem>>, vector<2x28x28xf32>
    tpu.vector_store %arg2[%c0_4, %c0_5, %c0_6], %11 {strides = array<i32>} : memref<2x28x28xf32, #tpu.memory_space<vmem>>, vector<2x28x28xf32>,
    return
  }
  func.func @transform_0(%arg0: i32) -> (i32, i32, i32) {
    %c0_i32 = arith.constant 0 : i32
    %c0_i32_0 = arith.constant 0 : i32
    %c0_i32_1 = arith.constant 0 : i32
    return %arg0, %c0_i32, %c0_i32_0 : i32, i32, i32
  }
  func.func @transform_1(%arg0: i32) -> (i32, i32, i32) {
    %c0_i32 = arith.constant 0 : i32
    %c0_i32_0 = arith.constant 0 : i32
    %c0_i32_1 = arith.constant 0 : i32
    return %arg0, %c0_i32, %c0_i32_0 : i32, i32, i32
  }
}

</mosaic_0001>

<bundles_post_ra>
// kernel: rnn_module_forward.1
= control target key start
LH: loop header
LB: loop body
LE: loop exit
PB: predicated region body
PF: predicated region fallthrough
CT: control target
= control target key end

     0   :  { %vm16_vm0 = vcmask 228352   ;;  %vm21_vm1 = vcmask 224256   ;;  %s220_s0 = inlined_call_operand.vmem [shape: f32[2,28,28], index: 0, kind: input, shape index: {}]   ;;  %s221_s1 = inlined_call_operand.vmem [shape: f32[2,28,28], index: 1, kind: output, shape index: {}]  }
   0x1   :  { %v8_v0 = vld [vmem:[%s220_s0] sm:$0xff]  ;;  %v9_v1 = vld [vmem:[%s220_s0 + $0x8] sm:$0xff]  ;;  %v10_v2 = vld [vmem:[%s220_s0 + $0x10] sm:$0xff] }
   0x2   :  { %v11_v3 = vld [vmem:[%s220_s0 + $0x18] sm:$0xf]  ;;  %v17_v4 = vsel %vm16_vm0, %v8_v0, -inf  ;;  %v18_v5 = vsel %vm16_vm0, %v9_v1, -inf  ;;  %v19_v6 = vsel %vm16_vm0, %v10_v2, -inf  ;;  %v12_v7 = vld [vmem:[%s220_s0 + $0x20] sm:$0xff] }
   0x3   :  { %v20_v8 = vmax.f32 %v17_v4, %v19_v6  ;;  %v22_v9 = vsel %vm21_vm1, %v11_v3, -inf  ;;  %v13_v10 = vld [vmem:[%s220_s0 + $0x28] sm:$0xff]  ;;  %v14_v11 = vld [vmem:[%s220_s0 + $0x30] sm:$0xff]  ;;  %v15_v12 = vld [vmem:[%s220_s0 + $0x38] sm:$0xf]  ;;  %v31_v13 = vsel %vm16_vm0, %v12_v7, -inf }
   0x4   :  { %v23_v14 = vmax.f32 %v18_v5, %v22_v9  ;;  %v32_v15 = vsel %vm16_vm0, %v13_v10, -inf  ;;  %v33_v16 = vsel %vm16_vm0, %v14_v11, -inf  ;;  %v35_v17 = vsel %vm21_vm1, %v15_v12, -inf }
   0x5   :  { %v34_v18 = vmax.f32 %v31_v13, %v33_v16  ;;  %v36_v19 = vmax.f32 %v32_v15, %v35_v17 }
   0x6   :  { %v24_v20 = vmax.f32 %v20_v8, %v23_v14 }
   0x7   :  { %v37_v21 = vmax.f32 %v34_v18, %v36_v19 }
   0x8   :  { %v25_v22 = vrot.slane %v24_v20, 4 }
   0x9   :  { %v38_v23 = vrot.slane %v37_v21, 4 }
   0xa   :  { %v26_v24 = vmax.f32 %v24_v20, %v25_v22 }
   0xb   :  { %v39_v25 = vmax.f32 %v37_v21, %v38_v23 }
   0xc   :  { %v27_v26 = vrot.slane %v26_v24, 2 }
   0xd   :  { %v40_v27 = vrot.slane %v39_v25, 2 }
   0xe   :  { %v28_v28 = vmax.f32 %v26_v24, %v27_v26 }
   0xf   :  { %v41_v29 = vmax.f32 %v39_v25, %v40_v27 }
  0x10   :  { %v29_v30 = vrot.slane %v28_v28, 1 }
  0x11   :  { %v42_v31 = vrot.slane %v41_v29, 1 }
  0x12   :  { %v30_v32 = vmax.f32 %v28_v28, %v29_v30 }
  0x13   :  { %v43_v33 = vmax.f32 %v41_v29, %v42_v31 }
  0x14   :  { %v44_v34 = vsub.f32 %v8_v0, %v30_v32  ;;  %v45_v35 = vsub.f32 %v9_v1, %v30_v32  ;;  %v46_v36 = vsub.f32 %v10_v2, %v30_v32  ;;  %v47_v37 = vsub.f32 %v11_v3, %v30_v32 }
  0x15   :  { %v48_v38 = vsub.f32 %v12_v7, %v43_v33  ;;  %v49_v39 = vsub.f32 %v13_v10, %v43_v33  ;;  %v50_v43 = vsub.f32 %v14_v11, %v43_v33  ;;  %v51_v45 = vsub.f32 %v15_v12, %v43_v33 }
  0x16   :  { %v52_v40 = vmul.f32 1.442695, %v44_v34  ;;  %v54_v41 = vmul.f32 1.442695, %v45_v35  ;;  %v56_v42 = vmul.f32 1.442695, %v46_v36 }
  0x17   :  { %v58_v44 = vmul.f32 1.442695, %v47_v37  ;;  %v60_v46 = vmul.f32 1.442695, %v48_v38  ;;  %v62_v47 = vmul.f32 1.442695, %v49_v39 }
  0x18   :  { %118 = vpow2.f32 %v52_v40  ;;  %v64_v48 = vmul.f32 1.442695, %v50_v43  ;;  %v66_v49 = vmul.f32 1.442695, %v51_v45 }
  0x19   :  { %120 = vpow2.f32 %v54_v41 }
  0x1a   :  { %122 = vpow2.f32 %v56_v42 }
  0x1b   :  { %124 = vpow2.f32 %v58_v44 }
  0x1c   :  { %126 = vpow2.f32 %v60_v46 }
  0x1d   :  { %128 = vpow2.f32 %v62_v47 }
  0x1e   :  { %130 = vpow2.f32 %v64_v48 }
  0x1f   :  { %132 = vpow2.f32 %v66_v49 }
  0x22   :  { %v119_v50 = vpop.eup %118 }
  0x23   :  { %v121_v51 = vpop.eup %120  ;;  %v68_v52 = vsel %vm16_vm0, %v119_v50, 0.0 }
  0x24   :  { %v123_v53 = vpop.eup %122  ;;  %v69_v54 = vsel %vm16_vm0, %v121_v51, 0.0 }
  0x25   :  { %v125_v55 = vpop.eup %124  ;;  %v70_v56 = vadd.f32 %v69_v54, %v68_v52  ;;  %v71_v57 = vsel %vm16_vm0, %v123_v53, 0.0 }
  0x26   :  { %v127_v58 = vpop.eup %126  ;;  %v73_v59 = vsel %vm21_vm1, %v125_v55, 0.0 }
  0x27   :  { %v129_v60 = vpop.eup %128  ;;  %v72_v61 = vadd.f32 %v71_v57, %v70_v56  ;;  %v81_v62 = vsel %vm16_vm0, %v127_v58, 0.0 }
  0x28   :  { %v131_v63 = vpop.eup %130  ;;  %v82_v0 = vsel %vm16_vm0, %v129_v60, 0.0 }
  0x29   :  { %v133_v1 = vpop.eup %132  ;;  %v74_v2 = vadd.f32 %v73_v59, %v72_v61  ;;  %v83_v3 = vadd.f32 %v82_v0, %v81_v62  ;;  %v84_v4 = vsel %vm16_vm0, %v131_v63, 0.0 }
  0x2a   :  { %v86_v5 = vsel %vm21_vm1, %v133_v1, 0.0 }
  0x2b   :  { %v75_v6 = vrot.slane %v74_v2, 4  ;;  %v85_v7 = vadd.f32 %v84_v4, %v83_v3 }
  0x2d   :  { %v76_v8 = vadd.f32 %v75_v6, %v74_v2  ;;  %v87_v9 = vadd.f32 %v86_v5, %v85_v7 }
  0x2f   :  { %v77_v10 = vrot.slane %v76_v8, 2  ;;  %v88_v11 = vrot.slane %v87_v9, 4 }
  0x31   :  { %v78_v12 = vadd.f32 %v77_v10, %v76_v8  ;;  %v89_v13 = vadd.f32 %v88_v11, %v87_v9 }
  0x33   :  { %v79_v14 = vrot.slane %v78_v12, 1  ;;  %v90_v15 = vrot.slane %v89_v13, 2 }
  0x35   :  { %v80_v16 = vadd.f32 %v79_v14, %v78_v12  ;;  %v91_v17 = vadd.f32 %v90_v15, %v89_v13 }
  0x37   :  { %134 = vrcp.f32 %v80_v16  ;;  %v92_v18 = vrot.slane %v91_v17, 1 }
  0x39   :  { %v93_v19 = vadd.f32 %v92_v18, %v91_v17 }
  0x3b   :  { %136 = vrcp.f32 %v93_v19 }
  0x41   :  { %v135_v20 = vpop.eup %134 }
  0x42   :  { %v98_v21 = vmul.f32 %v135_v20, %v119_v50  ;;  %v99_v22 = vmul.f32 %v135_v20, %v121_v51  ;;  %v100_v23 = vmul.f32 %v135_v20, %v123_v53  ;;  %v101_v24 = vmul.f32 %v135_v20, %v125_v55 }
  0x44   :  { %106 = vst.msk [vmem:[%s221_s1] sm:$0xff] %vm16_vm0, %v98_v21  ;;  %107 = vst.msk [vmem:[%s221_s1 + $0x8] sm:$0xff] %vm16_vm0, %v99_v22 }
  0x45   :  { %108 = vst.msk [vmem:[%s221_s1 + $0x10] sm:$0xff] %vm16_vm0, %v100_v23  ;;  %v137_v25 = vpop.eup %136 }
  0x46   :  { %109 = vst.msk [vmem:[%s221_s1 + $0x18] sm:$0xf] %vm21_vm1, %v101_v24  ;;  %v102_v26 = vmul.f32 %v137_v25, %v127_v58  ;;  %v103_v27 = vmul.f32 %v137_v25, %v129_v60  ;;  %v104_v28 = vmul.f32 %v137_v25, %v131_v63  ;;  %v105_v29 = vmul.f32 %v137_v25, %v133_v1 }
  0x48   :  { %110 = vst.msk [vmem:[%s221_s1 + $0x20] sm:$0xff] %vm16_vm0, %v102_v26  ;;  %111 = vst.msk [vmem:[%s221_s1 + $0x28] sm:$0xff] %vm16_vm0, %v103_v27 }
  0x49   :  { %112 = vst.msk [vmem:[%s221_s1 + $0x30] sm:$0xff] %vm16_vm0, %v104_v28 }
  0x4a   :  { %113 = vst.msk [vmem:[%s221_s1 + $0x38] sm:$0xf] %vm21_vm1, %v105_v29 }

</bundles_post_ra>
